<compile_context>
chip_gen: v7x
topology: tpu7x:2x2x1
jax: 0.10.0
libtpu: 0.0.40
codegen_flags: <defaults>
</compile_context>

<pallas_src>
import math

import jax
import jax.numpy as jnp
from jax.experimental import pallas as pl
from jax.experimental.pallas import tpu as pltpu

# Hopper-v2 dimensions (env.observation_space / env.action_space)
OBS_DIM = 11
ACT_DIM = 3
HIDDEN = 64

# Default batch tile; sweep 2048-8192 for large PPO rollout batches.
DEFAULT_BLOCK_BATCH = 4096


def _policy_kernel(x_ref, w1_ref, b1_ref, w2_ref, b2_ref, w3_ref, b3_ref,
                   mean_ref):
    h1 = jnp.tanh(
        jnp.dot(x_ref[...], w1_ref[...], preferred_element_type=jnp.float32)
        + b1_ref[...]
    )
    h2 = jnp.tanh(
        jnp.dot(h1, w2_ref[...], preferred_element_type=jnp.float32)
        + b2_ref[...]
    )
    mean_ref[...] = (
        jnp.dot(h2, w3_ref[...], preferred_element_type=jnp.float32)
        + b3_ref[...]
    ).astype(mean_ref.dtype)


def _round_up(n, m):
    return ((n + m - 1) // m) * m


def _pick_batch_tile(batch, block_batch):
    """Batch tile: multiple of 8, >= 2 grid steps when possible, <= block_batch."""
    if batch <= 8:
        # Block equal to the full array dim is allowed; single grid step.
        return batch
    padded8 = _round_up(batch, 8)
    # ceil(padded8/2) rounded to 8 -> at least 2 steps (v7x dual TC), and the
    # last-tile waste stays <= 8 rows until batch exceeds 2 * block_batch.
    return min(block_batch, _round_up(pl.cdiv(padded8, 2), 8))


def policy_network_forward(x, params, *, block_batch=DEFAULT_BLOCK_BATCH):
    """Run the PolicyNetwork forward pass as a batch-tiled Pallas kernel.

    Args:
      x: (batch, obs_dim) float32 observations.
      params: dict with w1,b1,w2,b2,w3,b3 ((in,out) weights, (1,out) biases)
        and logstd of shape (1, act_dim).

    Returns:
      (mean, std): mean is (batch, act_dim) f32, std is (act_dim,) f32.
    """
    batch, obs_dim = x.shape
    act_dim = params["w3"].shape[1]

    tb = _pick_batch_tile(batch, block_batch)
    grid = (pl.cdiv(batch, tb),)  # last tile may be partial; Pallas masks it

    def resident(arr):
        # Whole-array block, same block index every grid step -> stays in VMEM.
        return pl.BlockSpec(arr.shape, lambda i: (0, 0))

    mean = pl.pallas_call(
        _policy_kernel,
        out_shape=jax.ShapeDtypeStruct((batch, act_dim), jnp.float32),
        grid=grid,
        in_specs=[
            pl.BlockSpec((tb, obs_dim), lambda i: (i, 0)),   # x: tiled on batch
            resident(params["w1"]), resident(params["b1"]),
            resident(params["w2"]), resident(params["b2"]),
            resident(params["w3"]), resident(params["b3"]),
        ],
        out_specs=pl.BlockSpec((tb, act_dim), lambda i: (i, 0)),
        compiler_params=pltpu.CompilerParams(
            dimension_semantics=("parallel",),        # use both TCs on v7x
            vmem_limit_bytes=32 * 1024 * 1024,        # safe on 64 MiB v7x VMEM
        ),
    )(
        x,
        params["w1"], params["b1"],
        params["w2"], params["b2"],
        params["w3"], params["b3"],
    )

    # std is independent of x: compute once in the wrapper, not per grid step.
    std = jnp.exp(params["logstd"].reshape(-1))
    return mean, std


def init_params(key, obs_dim=OBS_DIM, act_dim=ACT_DIM, hidden=HIDDEN):
    """Deterministic init matching nn.Linear's U(-1/sqrt(fan_in), 1/sqrt(fan_in))."""
    ks = jax.random.split(key, 6)

    def linear(kw, kb, fan_in, fan_out):
        bound = 1.0 / math.sqrt(fan_in)
        w = jax.random.uniform(kw, (fan_in, fan_out), jnp.float32, -bound, bound)
        b = jax.random.uniform(kb, (1, fan_out), jnp.float32, -bound, bound)
        return w, b

    w1, b1 = linear(ks[0], ks[1], obs_dim, hidden)
    w2, b2 = linear(ks[2], ks[3], hidden, hidden)
    w3, b3 = linear(ks[4], ks[5], hidden, act_dim)
    logstd = jnp.zeros((1, act_dim), jnp.float32)  # nn.Parameter(torch.zeros(act_dim))
    return {"w1": w1, "b1": b1, "w2": w2, "b2": b2,
            "w3": w3, "b3": b3, "logstd": logstd}


def _reference_forward(x, p):
    h1 = jnp.tanh(x @ p["w1"] + p["b1"])
    h2 = jnp.tanh(h1 @ p["w2"] + p["b2"])
    mean = h2 @ p["w3"] + p["b3"]
    std = jnp.exp(p["logstd"].reshape(-1))
    return mean, std


if __name__ == "__main__":
    key = jax.random.PRNGKey(0)
    k_param, k_x1, k_x2, k_x3 = jax.random.split(key, 4)

    params = init_params(k_param)

    # Small aligned batch (single grid step, full-block path).
    batch = 8
    x = jax.random.normal(k_x1, (batch, OBS_DIM), jnp.float32)
    mean, std = policy_network_forward(x, params)
    jax.block_until_ready((mean, std))
    mean_ref, std_ref = _reference_forward(x, params)
    assert mean.shape == (batch, ACT_DIM)
    assert std.shape == (ACT_DIM,)
    assert jnp.allclose(mean, mean_ref, atol=1e-5, rtol=1e-5)
    assert jnp.allclose(std, std_ref, atol=1e-6, rtol=1e-6)

    # Batch not a multiple of 8 -> exercises the masked partial last tile
    # (tb=32, grid=2, no padding copy).
    batch2 = 50
    x2 = jax.random.normal(k_x2, (batch2, OBS_DIM), jnp.float32)
    mean2, std2 = policy_network_forward(x2, params)
    jax.block_until_ready((mean2, std2))
    mean2_ref, _ = _reference_forward(x2, params)
    assert mean2.shape == (batch2, ACT_DIM)
    assert jnp.allclose(mean2, mean2_ref, atol=1e-5, rtol=1e-5)

    # Larger batch -> 2 grid steps with a slightly-short second tile
    # (tb=1504 covers 3008 > 3000), checking the multi-tile masked path.
    batch3 = 3000
    x3 = jax.random.normal(k_x3, (batch3, OBS_DIM), jnp.float32)
    mean3, std3 = policy_network_forward(x3, params)
    jax.block_until_ready((mean3, std3))
    mean3_ref, _ = _reference_forward(x3, params)
    assert mean3.shape == (batch3, ACT_DIM)
    assert jnp.allclose(mean3, mean3_ref, atol=1e-5, rtol=1e-5)

    print("KERNEL_OK")
</pallas_src>

<mosaic_0001>
module attributes {stable_mosaic.version = 11 : i64} {
  func.func @_policy_kernel(%arg0: i32, %arg1: memref<8x11xf32, #tpu.memory_space<vmem>>, %arg2: memref<11x64xf32, #tpu.memory_space<vmem>>, %arg3: memref<1x64xf32, #tpu.memory_space<vmem>>, %arg4: memref<64x64xf32, #tpu.memory_space<vmem>>, %arg5: memref<1x64xf32, #tpu.memory_space<vmem>>, %arg6: memref<64x3xf32, #tpu.memory_space<vmem>>, %arg7: memref<1x3xf32, #tpu.memory_space<vmem>>, %arg8: memref<8x3xf32, #tpu.memory_space<vmem>>) attributes {dimension_semantics = [#tpu.dimension_semantics<parallel>], iteration_bounds = array<i64: 1>, scalar_prefetch = 0 : i64, scratch_operands = 0 : i64, tpu.core_type = #tpu.core_type<tc>, window_params = [{transform_indices = @transform_0, window_bounds = array<i64: 8, 11>}, {pipeline_mode = #tpu.pipeline_mode<synchronous>, transform_indices = @transform_1, window_bounds = array<i64: 11, 64>}, {pipeline_mode = #tpu.pipeline_mode<synchronous>, transform_indices = @transform_2, window_bounds = array<i64: 1, 64>}, {pipeline_mode = #tpu.pipeline_mode<synchronous>, transform_indices = @transform_3, window_bounds = array<i64: 64, 64>}, {pipeline_mode = #tpu.pipeline_mode<synchronous>, transform_indices = @transform_4, window_bounds = array<i64: 1, 64>}, {pipeline_mode = #tpu.pipeline_mode<synchronous>, transform_indices = @transform_5, window_bounds = array<i64: 64, 3>}, {pipeline_mode = #tpu.pipeline_mode<synchronous>, transform_indices = @transform_6, window_bounds = array<i64: 1, 3>}, {transform_indices = @transform_7, window_bounds = array<i64: 8, 3>}]} {
    %c0 = arith.constant 0 : index
    %c0_0 = arith.constant 0 : index
    %0 = vector.load %arg1[%c0, %c0_0] : memref<8x11xf32, #tpu.memory_space<vmem>>, vector<8x11xf32>
    %c0_1 = arith.constant 0 : index
    %c0_2 = arith.constant 0 : index
    %1 = vector.load %arg2[%c0_1, %c0_2] : memref<11x64xf32, #tpu.memory_space<vmem>>, vector<11x64xf32>
    %cst = arith.constant dense<0.000000e+00> : vector<8x64xf32>
    %2 = tpu.matmul %0, %1, %cst {dimension_numbers = #tpu.dot_dimension_numbers<[1], [0], [0], [1], [0, 0, 1, 1], [], []>} : vector<8x11xf32>, vector<11x64xf32>, vector<8x64xf32> -> vector<8x64xf32>
    %c0_3 = arith.constant 0 : index
    %c0_4 = arith.constant 0 : index
    %3 = vector.load %arg3[%c0_3, %c0_4] : memref<1x64xf32, #tpu.memory_space<vmem>>, vector<1x64xf32>
    %4 = vector.broadcast %3 : vector<1x64xf32> to vector<8x64xf32>
    %5 = arith.addf %2, %4 : vector<8x64xf32>
    %6 = math.tanh %5 : vector<8x64xf32>
    %c0_5 = arith.constant 0 : index
    %c0_6 = arith.constant 0 : index
    %7 = vector.load %arg4[%c0_5, %c0_6] : memref<64x64xf32, #tpu.memory_space<vmem>>, vector<64x64xf32>
    %cst_7 = arith.constant dense<0.000000e+00> : vector<8x64xf32>
    %8 = tpu.matmul %6, %7, %cst_7 {dimension_numbers = #tpu.dot_dimension_numbers<[1], [0], [0], [1], [0, 0, 1, 1], [], []>} : vector<8x64xf32>, vector<64x64xf32>, vector<8x64xf32> -> vector<8x64xf32>
    %c0_8 = arith.constant 0 : index
    %c0_9 = arith.constant 0 : index
    %9 = vector.load %arg5[%c0_8, %c0_9] : memref<1x64xf32, #tpu.memory_space<vmem>>, vector<1x64xf32>
    %10 = vector.broadcast %9 : vector<1x64xf32> to vector<8x64xf32>
    %11 = arith.addf %8, %10 : vector<8x64xf32>
    %12 = math.tanh %11 : vector<8x64xf32>
    %c0_10 = arith.constant 0 : index
    %c0_11 = arith.constant 0 : index
    %13 = vector.load %arg6[%c0_10, %c0_11] : memref<64x3xf32, #tpu.memory_space<vmem>>, vector<64x3xf32>
    %cst_12 = arith.constant dense<0.000000e+00> : vector<8x3xf32>
    %14 = tpu.matmul %12, %13, %cst_12 {dimension_numbers = #tpu.dot_dimension_numbers<[1], [0], [0], [1], [0, 0, 1, 1], [], []>} : vector<8x64xf32>, vector<64x3xf32>, vector<8x3xf32> -> vector<8x3xf32>
    %c0_13 = arith.constant 0 : index
    %c0_14 = arith.constant 0 : index
    %15 = vector.load %arg7[%c0_13, %c0_14] : memref<1x3xf32, #tpu.memory_space<vmem>>, vector<1x3xf32>
    %16 = vector.broadcast %15 : vector<1x3xf32> to vector<8x3xf32>
    %17 = arith.addf %14, %16 : vector<8x3xf32>
    %c0_15 = arith.constant 0 : index
    %c0_16 = arith.constant 0 : index
    %18 = vector.load %arg8[%c0_15, %c0_16] : memref<8x3xf32, #tpu.memory_space<vmem>>, vector<8x3xf32>
    tpu.vector_store %arg8[%c0_15, %c0_16], %17 {strides = array<i32>} : memref<8x3xf32, #tpu.memory_space<vmem>>, vector<8x3xf32>,
    return
  }
  func.func @transform_0(%arg0: i32) -> (i32, i32) {
    %c0_i32 = arith.constant 0 : i32
    %c0_i32_0 = arith.constant 0 : i32
    return %arg0, %c0_i32 : i32, i32
  }
  func.func @transform_1(%arg0: i32) -> (i32, i32) {
    %c0_i32 = arith.constant 0 : i32
    %c0_i32_0 = arith.constant 0 : i32
    %c0_i32_1 = arith.constant 0 : i32
    return %c0_i32, %c0_i32_0 : i32, i32
  }
  func.func @transform_2(%arg0: i32) -> (i32, i32) {
    %c0_i32 = arith.constant 0 : i32
    %c0_i32_0 = arith.constant 0 : i32
    %c0_i32_1 = arith.constant 0 : i32
    return %c0_i32, %c0_i32_0 : i32, i32
  }
  func.func @transform_3(%arg0: i32) -> (i32, i32) {
    %c0_i32 = arith.constant 0 : i32
    %c0_i32_0 = arith.constant 0 : i32
    %c0_i32_1 = arith.constant 0 : i32
    return %c0_i32, %c0_i32_0 : i32, i32
  }
  func.func @transform_4(%arg0: i32) -> (i32, i32) {
    %c0_i32 = arith.constant 0 : i32
    %c0_i32_0 = arith.constant 0 : i32
    %c0_i32_1 = arith.constant 0 : i32
    return %c0_i32, %c0_i32_0 : i32, i32
  }
  func.func @transform_5(%arg0: i32) -> (i32, i32) {
    %c0_i32 = arith.constant 0 : i32
    %c0_i32_0 = arith.constant 0 : i32
    %c0_i32_1 = arith.constant 0 : i32
    return %c0_i32, %c0_i32_0 : i32, i32
  }
  func.func @transform_6(%arg0: i32) -> (i32, i32) {
    %c0_i32 = arith.constant 0 : i32
    %c0_i32_0 = arith.constant 0 : i32
    %c0_i32_1 = arith.constant 0 : i32
    return %c0_i32, %c0_i32_0 : i32, i32
  }
  func.func @transform_7(%arg0: i32) -> (i32, i32) {
    %c0_i32 = arith.constant 0 : i32
    %c0_i32_0 = arith.constant 0 : i32
    return %arg0, %c0_i32 : i32, i32
  }
}

</mosaic_0001>

<bundles_post_ra>
// kernel: tpu_custom_call.1
= control target key start
LH: loop header
LB: loop body
LE: loop exit
PB: predicated region body
PF: predicated region fallthrough
CT: control target
= control target key end

     0   :  { %12 = vsyncpa [#allocation3], 0  ;;  %s450_s24 = smov [#allocation2]   ;;  %s586_s0 = inlined_call_operand.vmem [shape: f32[8,11], index: 0, kind: input, shape index: {}]   ;;  %s587_s1 = inlined_call_operand.hbm [shape: f32[11,64], index: 1, kind: input, shape index: {}]   ;;  %s588_s2 = inlined_call_operand.vmem [shape: f32[1,64], index: 2, kind: input, shape index: {}]   ;;  %s589_s3 = inlined_call_operand.vmem [shape: f32[64,64], index: 3, kind: input, shape index: {}]   ;;  %s590_s4 = inlined_call_operand.vmem [shape: f32[1,64], index: 4, kind: input, shape index: {}]   ;;  %s591_s5 = inlined_call_operand.vmem [shape: f32[64,3], index: 5, kind: input, shape index: {}]   ;;  %s592_s6 = inlined_call_operand.vmem [shape: f32[1,3], index: 6, kind: input, shape index: {}]   ;;  %s593_s7 = inlined_call_operand.vmem [shape: f32[8,3], index: 7, kind: output, shape index: {}]  }
   0x1   :  { %s20_s25 = sshll.u32 %s450_s24, 4  ;;  %s426_s28 = scalar_lea.hbm %s587_s1, 256  ;;  %s21_s25 = int_to_ptr.vmem [resolvable:$true] %s20_s25 }
   0x2   :  { %p427_p0 = scmp.ne.s32.totalorder %s587_s1, %s426_s28  ;;  %p430_p1 = scmp.lt.u32.totalorder %s426_s28, %s587_s1 }
   0x4   :  { %p432_p2 = pnand %p430_p1, %p427_p0 }
   0x6   :  { %435 = shalt.err (!%p432_p2)
}
   0x7   :  { %s436_s10 = scalar_lea.vmem %s21_s25, 256  ;;  %p441_p4 = scmp.lt.s32.totalorder %s21_s25, %s21_s25 }
   0x8   :  { %p437_p3 = scmp.ne.s32.totalorder %s21_s25, %s436_s10  ;;  %p442_p5 = scmp.lt.s32.totalorder %s436_s10, %s436_s10 }
   0xa   :  { %p443_p6 = por %p442_p5, %p441_p4 }
   0xc   :  { %p444_p7 = pnand %p443_p6, %p437_p3 }
   0xe   :  { %447 = shalt.err (!%p444_p7)
}
   0xf   :  { %s451_s11 = smov 128   ;;  %s452_s12 = smov 8  }
  0x10   :  { %26 = dma.hbm_to_vmem [thread:$0]  %s587_s1, 256, %s21_s25, [#allocation3], %s451_s11, %s451_s11, %s452_s12  }
  0x11   :  { %448 = dma.done.wait [#allocation3], 256  }
  0x12   :  { %449 = vsyncadd [#allocation3], 4294967040  ;;  %v453_v0 = vmov 0.0|0.0   ;;  %vm454_vm0 = vmmov 0   ;;  %v455_v1 = vmov 0.0   ;;  %vm54_vm1 = vcmask 1042432  }
  0x13   :  { %387 = vmatprep.subr.bf16.mxu0 %v453_v0  ;;  %391 = vmatprep.subr.bf16.mxu1 %v453_v0  ;;  %v41_v2 = vld [vmem:[#allocation2] sm:$0xff]  ;;  %v42_v3 = vld [vmem:[#allocation2 + $0x8] sm:$0x7]  ;;  %vm456_vm2 = vmmov 1   ;;  %vm50_vm4 = vcmask 89088   ;;  %v131_v9 = vld [vmem:[%s589_s3 + $0x10] sm:$0xff] }
  0x14   :  { %346 = vmatprep.mubr.msk.f32.mxu0 %vm454_vm0, %v455_v1  ;;  %365 = vmatprep.mubr.msk.f32.mxu1 %vm454_vm0, %v455_v1  ;;  %vm389_vm3 = vmpackc.low %vm54_vm1, %vm456_vm2  ;;  %v388_v4 = vpack.c.bf16 %v42_v3, %v41_v2  ;;  %v129_v5 = vld [vmem:[%s589_s3] sm:$0xff]  ;;  %v130_v6 = vld [vmem:[%s589_s3 + $0x8] sm:$0xff]  ;;  %vm144_vm5 = vcmask 523264   ;;  %vm307_vm6 = vcmask 23552  }
  0x15   :  { %v392_v7 = vpack.c.bf16 %v130_v6, %v129_v5  ;;  %v40_v8 = vld [vmem:[%s586_s0] sm:$0xff]  ;;  %v132_v10 = vld [vmem:[%s589_s3 + $0x18] sm:$0xff]  ;;  %v134_v13 = vld [vmem:[%s589_s3 + $0x28] sm:$0xff] }
  0x16   :  { %390 = vmatpush3.bf16.msk.msra.mxu0 %vm389_vm3, %v388_v4  ;;  %v395_v11 = vpack.c.bf16 %v132_v10, %v131_v9  ;;  %v133_v12 = vld [vmem:[%s589_s3 + $0x20] sm:$0xff]  ;;  %v135_v15 = vld [vmem:[%s589_s3 + $0x30] sm:$0xff]  ;;  %v136_v16 = vld [vmem:[%s589_s3 + $0x38] sm:$0xff] }
  0x17   :  { %393 = vmatpush3.bf16.msra.mxu1 %v392_v7  ;;  %403 = vmatprep.subr.bf16.mxu0 %v453_v0  ;;  %v398_v14 = vpack.c.bf16 %v134_v13, %v133_v12  ;;  %v401_v17 = vpack.c.bf16 %v136_v16, %v135_v15  ;;  %v219_v18 = vld [vmem:[%s591_s5] sm:$0xff]  ;;  %v220_v19 = vld [vmem:[%s591_s5 + $0x8] sm:$0xff]  ;;  %v221_v26 = vld [vmem:[%s591_s5 + $0x10] sm:$0xff] }
  0x18   :  { %394 = vmatprep.subr.bf16.mxu1 %v453_v0  ;;  %v404_v20 = vpack.c.bf16 %v220_v19, %v219_v18  ;;  %v314_v21 = vld [vmem:[%s588_s2] ss:$0 sm:$0xff]  ;;  %v222_v27 = vld [vmem:[%s591_s5 + $0x18] sm:$0xff]  ;;  %v224_v30 = vld [vmem:[%s591_s5 + $0x28] sm:$0xff] }
  0x19   :  { %347 = vmatmul.mubr.msk.f32.vlgmr.msra.gmra.mrb[0].mxu0 %vm50_vm4, %v40_v8  ;;  %v407_v28 = vpack.c.bf16 %v222_v27, %v221_v26  ;;  %v223_v29 = vld [vmem:[%s591_s5 + $0x20] sm:$0xff]  ;;  %v225_v32 = vld [vmem:[%s591_s5 + $0x30] sm:$0xff]  ;;  %v226_v33 = vld [vmem:[%s591_s5 + $0x38] sm:$0xff] }
  0x1a   :  { %384 = vmatprep.mubr.msk.f32.mxu0 %vm454_vm0, %v455_v1  ;;  %405 = vmatpush3.bf16.msra.mxu0 %v404_v20  ;;  %v410_v31 = vpack.c.bf16 %v224_v30, %v223_v29  ;;  %v413_v34 = vpack.c.bf16 %v226_v33, %v225_v32  ;;  %v317_v35 = vld [vmem:[%s590_s4] ss:$0 sm:$0xff] }
  0x1b   :  { %396 = vmatpush3.bf16.msra.mxu1 %v395_v11  ;;  %406 = vmatprep.subr.bf16.mxu0 %v453_v0  ;;  %v319_v40 = vld [vmem:[%s592_s6] ss:$0 sm:$0xff] }
  0x1c   :  { %397 = vmatprep.subr.bf16.mxu1 %v453_v0 }
  0x1e   :  { %408 = vmatpush3.bf16.msra.mxu0 %v407_v28 }
  0x1f   :  { %399 = vmatpush3.bf16.msra.mxu1 %v398_v14  ;;  %409 = vmatprep.subr.bf16.mxu0 %v453_v0 }
  0x20   :  { %400 = vmatprep.subr.bf16.mxu1 %v453_v0 }
  0x22   :  { %411 = vmatpush3.bf16.msra.mxu0 %v410_v31 }
  0x23   :  { %402 = vmatpush3.bf16.msra.mxu1 %v401_v17  ;;  %412 = vmatprep.subr.bf16.mxu0 %v453_v0 }
  0x26   :  { %414 = vmatpush3.bf16.msra.mxu0 %v413_v34 }
  0xec   :  { %v124_v22 = vpop.f32.mrb[0].mxu0 }
  0xed   :  { %v125_v23 = vadd.f32 %v314_v21, %v124_v22  ;;  %v348_v24 = vpop.f32.mrb[1].mxu0 }
  0xef   :  { %422 = vtanh.f32 %v125_v23 }
  0xf9   :  { %v423_v25 = vpop.eup %422 }
  0xfa   :  { %366 = vmatmul.mubr.msk.f32.vlgmr.msra.gmra.mrb[0].mxu1 %vm144_vm5, %v423_v25 }
 0x1cd   :  { %v214_v36 = vpop.f32.mrb[0].mxu1 }
 0x1ce   :  { %v215_v37 = vadd.f32 %v317_v35, %v214_v36  ;;  %v367_v38 = vpop.f32.mrb[1].mxu1 }
 0x1d0   :  { %424 = vtanh.f32 %v215_v37 }
 0x1da   :  { %v425_v39 = vpop.eup %424 }
 0x1db   :  { %385 = vmatmul.mubr.msk.f32.vlgmr.msra.gmra.mrb[2].mxu0 %vm144_vm5, %v425_v39 }
 0x2ae   :  { %v303_v41 = vpop.f32.mrb[2].mxu0 }
 0x2af   :  { %v304_v42 = vadd.f32 %v319_v40, %v303_v41  ;;  %v386_v43 = vpop.f32.mrb[3].mxu0 }
 0x2b1   :  { %308 = vst.msk [vmem:[%s593_s7] sm:$0xff] %vm307_vm6, %v304_v42 }
 0x2b2   :  { %313 = vsyncpa [#allocation3], 1 }

</bundles_post_ra>
